<compile_context>
chip_gen: v5e
topology: v5e:2x2
jax: 0.10.0
libtpu: 0.0.40
codegen_flags: <defaults>
</compile_context>

<pallas_src>
import functools
import math

import jax
import jax.numpy as jnp
from jax.experimental import pallas as pl
from jax.experimental.pallas import tpu as pltpu

_ACT_DTYPE = jnp.bfloat16
_VMEM_LIMIT = 32 * 1024 * 1024  # stays well under v7x's 64 MiB physical VMEM


# ----------------------------------------------------------------------------
# Small helpers
# ----------------------------------------------------------------------------
def _round_up(x, m):
    return ((x + m - 1) // m) * m


def _pick_tile(dim, cap, base):
    # dim is a multiple of `base`; return the largest multiple of `base`
    # that is <= min(dim, cap) and divides dim.
    t = min(dim, cap)
    t = max(base, (t // base) * base)
    while dim % t:
        t -= base
    return t


# ----------------------------------------------------------------------------
# Pallas kernels
# ----------------------------------------------------------------------------
def _gemm_bias_act_kernel(has_residual: bool, apply_relu: bool):
    """Full-K GEMM with fused bias (folded BN), optional residual add, ReLU."""
    if has_residual:
        def kernel(a_ref, b_ref, c_ref, r_ref, o_ref):
            acc = jnp.dot(a_ref[...], b_ref[...],
                          preferred_element_type=jnp.float32)
            y = acc + c_ref[...] + r_ref[...].astype(jnp.float32)
            if apply_relu:
                y = jnp.maximum(y, 0.0)
            o_ref[...] = y.astype(o_ref.dtype)
    else:
        def kernel(a_ref, b_ref, c_ref, o_ref):
            acc = jnp.dot(a_ref[...], b_ref[...],
                          preferred_element_type=jnp.float32)
            y = acc + c_ref[...]
            if apply_relu:
                y = jnp.maximum(y, 0.0)
            o_ref[...] = y.astype(o_ref.dtype)
    return kernel


def _fused_gemm(a, b, bias, residual, apply_relu):
    """a:[Mp,Kp] bf16, b:[Kp,Np] bf16, bias:[1,Np] f32, residual:[Mp,Np] bf16|None."""
    Mp, Kp = a.shape
    Np = b.shape[1]
    tm = _pick_tile(Mp, 256, 16)     # 16: bf16 sublane packing
    tn = _pick_tile(Np, 512, 128)
    grid = (Mp // tm, Np // tn)

    in_specs = [
        pl.BlockSpec((tm, Kp), lambda i, j: (i, 0)),
        pl.BlockSpec((Kp, tn), lambda i, j: (0, j)),
        pl.BlockSpec((1, tn), lambda i, j: (0, j)),
    ]
    args = [a, b, bias]
    if residual is not None:
        in_specs.append(pl.BlockSpec((tm, tn), lambda i, j: (i, j)))
        args.append(residual)

    kernel = _gemm_bias_act_kernel(residual is not None, apply_relu)
    return pl.pallas_call(
        kernel,
        out_shape=jax.ShapeDtypeStruct((Mp, Np), _ACT_DTYPE),
        grid_spec=pltpu.PrefetchScalarGridSpec(
            num_scalar_prefetch=0,
            grid=grid,
            in_specs=in_specs,
            out_specs=pl.BlockSpec((tm, tn), lambda i, j: (i, j)),
        ),
        compiler_params=pltpu.CompilerParams(
            dimension_semantics=("parallel", "parallel"),
            vmem_limit_bytes=_VMEM_LIMIT,
        ),
    )(*args)


def _conv3x3_direct_kernel(N, Ho, Wo, dilation, apply_relu):
    """Direct 3x3 stride-1 conv: padded NHWC input resident in VMEM, 9 taps
    accumulated in-kernel (no im2col materialization in HBM)."""
    def kernel(x_ref, w_ref, c_ref, o_ref):
        bias = c_ref[...]                                   # (1, tn) f32
        taps = [w_ref[t, :, :] for t in range(9)]           # (Cp, tn) bf16 each
        for n in range(N):
            for ho in range(Ho):
                rows = [x_ref[n, ho + ki * dilation, :, :] for ki in range(3)]
                acc = None
                for ki in range(3):
                    for kj in range(3):
                        ws = kj * dilation
                        xs = rows[ki][ws:ws + Wo, :]         # (Wo, Cp) bf16
                        contrib = jnp.dot(xs, taps[ki * 3 + kj],
                                          preferred_element_type=jnp.float32)
                        acc = contrib if acc is None else acc + contrib
                y = acc + bias
                if apply_relu:
                    y = jnp.maximum(y, 0.0)
                o_ref[n, ho, :, :] = y.astype(o_ref.dtype)
    return kernel


def _conv3x3_direct(xp, w, bias, Ho, Wo, dilation, apply_relu):
    """xp:[N,Hp,Wp,Cp] bf16 (spatial+channel padded), w:[9,Cp,Np] bf16, bias:[1,Np]."""
    N, Hp, Wp, Cp = xp.shape
    Np = w.shape[2]
    tn = _pick_tile(Np, 256, 128)
    kernel = _conv3x3_direct_kernel(N, Ho, Wo, dilation, apply_relu)
    return pl.pallas_call(
        kernel,
        out_shape=jax.ShapeDtypeStruct((N, Ho, Wo, Np), _ACT_DTYPE),
        grid_spec=pltpu.PrefetchScalarGridSpec(
            num_scalar_prefetch=0,
            grid=(Np // tn,),
            in_specs=[
                pl.BlockSpec((N, Hp, Wp, Cp), lambda j: (0, 0, 0, 0)),
                pl.BlockSpec((9, Cp, tn), lambda j: (0, 0, j)),
                pl.BlockSpec((1, tn), lambda j: (0, j)),
            ],
            out_specs=pl.BlockSpec((N, Ho, Wo, tn), lambda j: (0, 0, 0, j)),
        ),
        compiler_params=pltpu.CompilerParams(
            dimension_semantics=("parallel",),
            vmem_limit_bytes=_VMEM_LIMIT,
        ),
    )(xp, w, bias)


def _maxpool_kernel(x_ref, o_ref):
    # x_ref: [9, tm, Cp] window slices; reduce over the window axis.
    o_ref[...] = jnp.max(x_ref[...], axis=0)


# ----------------------------------------------------------------------------
# Conv / pool wrappers (traced inside jitted block functions)
# ----------------------------------------------------------------------------
def _extract_patches(x, kh, kw, stride, dilation, pad):
    """im2col (only used for 7x7 stem and the two stride-2 3x3 convs)."""
    N, H, W, C = x.shape
    Ho = (H + 2 * pad - dilation * (kh - 1) - 1) // stride + 1
    Wo = (W + 2 * pad - dilation * (kw - 1) - 1) // stride + 1
    xp = jnp.pad(x, ((0, 0), (pad, pad), (pad, pad), (0, 0)))
    cols = []
    for ki in range(kh):
        for kj in range(kw):
            hs = ki * dilation
            ws = kj * dilation
            cols.append(
                xp[:, hs: hs + (Ho - 1) * stride + 1: stride,
                      ws: ws + (Wo - 1) * stride + 1: stride, :]
            )
    return jnp.concatenate(cols, axis=-1), Ho, Wo


def conv1x1_bn_act(x, p, *, stride, cout, relu, residual=None):
    """1x1 conv + folded BN (+residual) (+ReLU). x: NHWC bf16."""
    if stride > 1:
        x = x[:, ::stride, ::stride, :]
    N, H, W, C = x.shape
    M = N * H * W
    Kp, Np = p["w"].shape
    Mp = _round_up(M, 16)
    a = jnp.pad(x.reshape(M, C), ((0, Mp - M), (0, Kp - C)))
    r = None
    if residual is not None:
        rc = residual.shape[-1]
        r = jnp.pad(residual.reshape(M, rc), ((0, Mp - M), (0, Np - rc)))
    out = _fused_gemm(a, p["w"], p["b"], r, relu)
    return out[:M, :cout].reshape(N, H, W, cout)


def conv3x3_bn_act(x, p, *, stride, dilation, cout, relu):
    """3x3 conv + folded BN (+ReLU). Direct tap-accumulation kernel for stride 1."""
    N, H, W, C = x.shape
    pad = dilation
    Ho = (H + 2 * pad - 2 * dilation - 1) // stride + 1
    Wo = (W + 2 * pad - 2 * dilation - 1) // stride + 1
    _, Cp, Np = p["w"].shape

    if stride == 1 and N * Ho <= 64:
        xp = jnp.pad(x, ((0, 0), (pad, pad), (pad, pad), (0, Cp - C)))
        out = _conv3x3_direct(xp, p["w"], p["b"], Ho, Wo, dilation, relu)
        return out[..., :cout]

    # Fallback: im2col + GEMM (only the 2 stride-2 convs at these configs).
    xc = jnp.pad(x, ((0, 0), (0, 0), (0, 0), (0, Cp - C)))
    patches, Ho, Wo = _extract_patches(xc, 3, 3, stride, dilation, pad)
    M = N * Ho * Wo
    K = 9 * Cp
    Mp = _round_up(M, 16)
    a = jnp.pad(patches.reshape(M, K), ((0, Mp - M), (0, 0)))
    out = _fused_gemm(a, p["w"].reshape(K, Np), p["b"], None, relu)
    return out[:M, :cout].reshape(N, Ho, Wo, cout)


def conv7x7_bn_relu(x, p, *, stride, pad, cout):
    N = x.shape[0]
    patches, Ho, Wo = _extract_patches(x, 7, 7, stride, 1, pad)
    M = N * Ho * Wo
    K = patches.shape[-1]
    Kp, Np = p["w"].shape
    Mp = _round_up(M, 16)
    a = jnp.pad(patches.reshape(M, K), ((0, Mp - M), (0, Kp - K)))
    out = _fused_gemm(a, p["w"], p["b"], None, True)
    return out[:M, :cout].reshape(N, Ho, Wo, cout)


def maxpool_3x3_s2(x):
    """MaxPool2d(kernel=3, stride=2, padding=1) on NHWC, tiled over rows."""
    N, H, W, C = x.shape
    Ho = (H + 2 - 3) // 2 + 1
    Wo = (W + 2 - 3) // 2 + 1
    xp = jnp.pad(x, ((0, 0), (1, 1), (1, 1), (0, 0)),
                 constant_values=-jnp.inf)
    slices = []
    for ki in range(3):
        for kj in range(3):
            slices.append(
                xp[:, ki: ki + (Ho - 1) * 2 + 1: 2,
                      kj: kj + (Wo - 1) * 2 + 1: 2, :]
            )
    M = N * Ho * Wo
    stk = jnp.stack(slices, axis=0).reshape(9, M, C)
    Mp = _round_up(M, 16)
    Cp = _round_up(C, 128)
    stk = jnp.pad(stk, ((0, 0), (0, Mp - M), (0, Cp - C)),
                  constant_values=-jnp.inf)
    tm = _pick_tile(Mp, 512, 16)

    out = pl.pallas_call(
        _maxpool_kernel,
        out_shape=jax.ShapeDtypeStruct((Mp, Cp), _ACT_DTYPE),
        grid_spec=pltpu.PrefetchScalarGridSpec(
            num_scalar_prefetch=0,
            grid=(Mp // tm,),
            in_specs=[pl.BlockSpec((9, tm, Cp), lambda i: (0, i, 0))],
            out_specs=pl.BlockSpec((tm, Cp), lambda i: (i, 0)),
        ),
        compiler_params=pltpu.CompilerParams(
            dimension_semantics=("parallel",),
            vmem_limit_bytes=_VMEM_LIMIT,
        ),
    )(stk)
    return out[:M, :C].reshape(N, Ho, Wo, C)


# ----------------------------------------------------------------------------
# Jitted block-level forward functions (cached per shape signature)
# ----------------------------------------------------------------------------
@jax.jit
def stem_forward(x_nchw, stem_p):
    x = jnp.transpose(x_nchw, (0, 2, 3, 1)).astype(_ACT_DTYPE)
    x = conv7x7_bn_relu(x, stem_p, stride=2, pad=3, cout=64)
    return maxpool_3x3_s2(x)


@functools.partial(jax.jit, static_argnames=("stride", "dilation", "planes"))
def bottleneck_block(x, bp, *, stride, dilation, planes):
    expansion = 4
    if bp.get("downsample") is not None:
        identity = conv1x1_bn_act(x, bp["downsample"], stride=stride,
                                  cout=planes * expansion, relu=False)
    else:
        identity = x
    out = conv1x1_bn_act(x, bp["conv1"], stride=1, cout=planes, relu=True)
    out = conv3x3_bn_act(out, bp["conv2"], stride=stride, dilation=dilation,
                         cout=planes, relu=True)
    out = conv1x1_bn_act(out, bp["conv3"], stride=1, cout=planes * expansion,
                         relu=True, residual=identity)
    return out


# ----------------------------------------------------------------------------
# Parameter construction (He init, eval-mode BN folded into weights at init)
# ----------------------------------------------------------------------------
def init_resnet101(key, output_stride=16):
    if output_stride == 16:
        rswd = [False, False, True]
    elif output_stride == 8:
        rswd = [False, True, True]
    else:
        raise NotImplementedError("Wrong output_stride.")

    counter = [0]

    def next_key():
        counter[0] += 1
        return jax.random.fold_in(key, counter[0])

    def conv_w(cout, cin, kh, kw):
        fan_in = cin * kh * kw
        std = math.sqrt(2.0 / fan_in)
        return jax.random.normal(next_key(), (cout, cin, kh, kw), jnp.float32) * std

    def bn_identity(c):
        return {"gamma": jnp.ones((c,), jnp.float32),
                "beta": jnp.zeros((c,), jnp.float32),
                "mean": jnp.zeros((c,), jnp.float32),
                "var": jnp.ones((c,), jnp.float32)}

    def prep(w_oihw, bn, layout):
        """Fold eval-mode BN into weight/bias; pre-transpose+pad to kernel layout."""
        cout, cin, kh, kw = w_oihw.shape
        eps = 1e-5
        scale = bn["gamma"] / jnp.sqrt(bn["var"] + eps)
        bias = bn["beta"] - bn["mean"] * scale
        w = jnp.transpose(w_oihw, (2, 3, 1, 0)) * scale[None, None, None, :]
        Np = _round_up(cout, 128)
        if layout == "taps":                       # 3x3: [9, Cp, Np]
            Cp = _round_up(cin, 128)
            w = jnp.pad(w, ((0, 0), (0, 0), (0, Cp - cin), (0, Np - cout)))
            w = w.reshape(kh * kw, Cp, Np)
        else:                                      # 1x1 / 7x7: [Kp, Np]
            K = kh * kw * cin
            Kp = _round_up(K, 128)
            w = jnp.pad(w.reshape(K, cout), ((0, Kp - K), (0, Np - cout)))
        b = jnp.pad(bias, (0, Np - cout)).reshape(1, Np)
        return {"w": w.astype(_ACT_DTYPE), "b": b.astype(jnp.float32)}

    params = {"stem": prep(conv_w(64, 3, 7, 7), bn_identity(64), "flat")}
    cfg = {"layers": []}
    layers_p = []

    inplanes = 64
    dilation = 1
    layer_cfgs = [(64, 3, 1, False), (128, 4, 2, rswd[0]),
                  (256, 23, 2, rswd[1]), (512, 3, 2, rswd[2])]
    for planes, blocks, stride, dilate in layer_cfgs:
        previous_dilation = dilation
        if dilate:
            dilation *= stride
            stride = 1
        blk_cfg_list, blk_p_list = [], []
        for bi in range(blocks):
            bstride = stride if bi == 0 else 1
            bdil = previous_dilation if bi == 0 else dilation
            bp = {
                "conv1": prep(conv_w(planes, inplanes, 1, 1),
                              bn_identity(planes), "flat"),
                "conv2": prep(conv_w(planes, planes, 3, 3),
                              bn_identity(planes), "taps"),
                "conv3": prep(conv_w(planes * 4, planes, 1, 1),
                              bn_identity(planes * 4), "flat"),
            }
            if bi == 0 and (bstride != 1 or inplanes != planes * 4):
                bp["downsample"] = prep(conv_w(planes * 4, inplanes, 1, 1),
                                        bn_identity(planes * 4), "flat")
            else:
                bp["downsample"] = None
            blk_p_list.append(bp)
            blk_cfg_list.append({"stride": bstride, "dilation": bdil,
                                 "planes": planes})
            inplanes = planes * 4
        cfg["layers"].append(blk_cfg_list)
        layers_p.append(blk_p_list)
    params["layers"] = layers_p
    return cfg, params


# ----------------------------------------------------------------------------
# Forward
# ----------------------------------------------------------------------------
def resnet101_forward(x_nchw, cfg, params):
    x = stem_forward(x_nchw, params["stem"])
    for layer_cfg, layer_p in zip(cfg["layers"], params["layers"]):
        for bcfg, bp in zip(layer_cfg, layer_p):
            x = bottleneck_block(x, bp, stride=bcfg["stride"],
                                 dilation=bcfg["dilation"],
                                 planes=bcfg["planes"])
    # NHWC bf16 -> NCHW f32 (PyTorch parity).
    return jnp.transpose(x, (0, 3, 1, 2)).astype(jnp.float32)


# ----------------------------------------------------------------------------
# Main
# ----------------------------------------------------------------------------
if __name__ == "__main__":
    key = jax.random.PRNGKey(0)
    pkey, xkey = jax.random.split(key)

    cfg, params = init_resnet101(pkey, output_stride=16)
    x = jax.random.normal(xkey, (2, 3, 32, 32), jnp.float32)  # NCHW input

    y = resnet101_forward(x, cfg, params)
    y = jax.block_until_ready(y)

    assert y.shape == (2, 2048, 2, 2), y.shape
    assert bool(jnp.all(jnp.isfinite(y)))
    print("KERNEL_OK")
</pallas_src>

<mosaic_0001>
module attributes {stable_mosaic.version = 11 : i64} {
  func.func @kernel(%arg0: i32, %arg1: i32, %arg2: memref<256x256xbf16, #tpu.memory_space<vmem>>, %arg3: memref<256x128xbf16, #tpu.memory_space<vmem>>, %arg4: memref<1x128xf32, #tpu.memory_space<vmem>>, %arg5: memref<256x128xbf16, #tpu.memory_space<vmem>>) attributes {dimension_semantics = [#tpu.dimension_semantics<parallel>, #tpu.dimension_semantics<parallel>], iteration_bounds = array<i64: 2, 1>, scalar_prefetch = 0 : i64, scratch_operands = 0 : i64, tpu.core_type = #tpu.core_type<tc>, window_params = [{transform_indices = @transform_0, window_bounds = array<i64: 256, 256>}, {transform_indices = @transform_1, window_bounds = array<i64: 256, 128>}, {transform_indices = @transform_2, window_bounds = array<i64: 1, 128>}, {transform_indices = @transform_3, window_bounds = array<i64: 256, 128>}]} {
    %c0 = arith.constant 0 : index
    %c0_0 = arith.constant 0 : index
    %0 = vector.load %arg2[%c0, %c0_0] : memref<256x256xbf16, #tpu.memory_space<vmem>>, vector<256x256xbf16>
    %c0_1 = arith.constant 0 : index
    %c0_2 = arith.constant 0 : index
    %1 = vector.load %arg3[%c0_1, %c0_2] : memref<256x128xbf16, #tpu.memory_space<vmem>>, vector<256x128xbf16>
    %cst = arith.constant dense<0.000000e+00> : vector<256x128xf32>
    %2 = tpu.matmul %0, %1, %cst {dimension_numbers = #tpu.dot_dimension_numbers<[1], [0], [0], [1], [0, 0, 1, 1], [], []>} : vector<256x256xbf16>, vector<256x128xbf16>, vector<256x128xf32> -> vector<256x128xf32>
    %c0_3 = arith.constant 0 : index
    %c0_4 = arith.constant 0 : index
    %3 = vector.load %arg4[%c0_3, %c0_4] : memref<1x128xf32, #tpu.memory_space<vmem>>, vector<1x128xf32>
    %4 = vector.broadcast %3 : vector<1x128xf32> to vector<256x128xf32>
    %5 = arith.addf %2, %4 : vector<256x128xf32>
    %cst_5 = arith.constant 0.000000e+00 : f32
    %6 = vector.broadcast %cst_5 : f32 to vector<256x128xf32>
    %7 = arith.maximumf %5, %6 : vector<256x128xf32>
    %8 = arith.truncf %7 : vector<256x128xf32> to vector<256x128xbf16>
    %c0_6 = arith.constant 0 : index
    %c0_7 = arith.constant 0 : index
    %9 = vector.load %arg5[%c0_6, %c0_7] : memref<256x128xbf16, #tpu.memory_space<vmem>>, vector<256x128xbf16>
    tpu.vector_store %arg5[%c0_6, %c0_7], %8 {strides = array<i32>} : memref<256x128xbf16, #tpu.memory_space<vmem>>, vector<256x128xbf16>,
    return
  }
  func.func @transform_0(%arg0: i32, %arg1: i32) -> (i32, i32) {
    %c0_i32 = arith.constant 0 : i32
    %c0_i32_0 = arith.constant 0 : i32
    return %arg0, %c0_i32 : i32, i32
  }
  func.func @transform_1(%arg0: i32, %arg1: i32) -> (i32, i32) {
    %c0_i32 = arith.constant 0 : i32
    %c0_i32_0 = arith.constant 0 : i32
    return %c0_i32, %arg1 : i32, i32
  }
  func.func @transform_2(%arg0: i32, %arg1: i32) -> (i32, i32) {
    %c0_i32 = arith.constant 0 : i32
    %c0_i32_0 = arith.constant 0 : i32
    return %c0_i32, %arg1 : i32, i32
  }
  func.func @transform_3(%arg0: i32, %arg1: i32) -> (i32, i32) {
    %c0_i32 = arith.constant 0 : i32
    return %arg0, %arg1 : i32, i32
  }
}

module attributes {stable_mosaic.version = 11 : i64} {
  func.func @_maxpool_kernel(%arg0: i32, %arg1: memref<9x128x128xbf16, #tpu.memory_space<vmem>>, %arg2: memref<128x128xbf16, #tpu.memory_space<vmem>>) attributes {dimension_semantics = [#tpu.dimension_semantics<parallel>], iteration_bounds = array<i64: 1>, scalar_prefetch = 0 : i64, scratch_operands = 0 : i64, tpu.core_type = #tpu.core_type<tc>, window_params = [{transform_indices = @transform_0, window_bounds = array<i64: 9, 128, 128>}, {transform_indices = @transform_1, window_bounds = array<i64: 128, 128>}]} {
    %c0 = arith.constant 0 : index
    %c0_0 = arith.constant 0 : index
    %c0_1 = arith.constant 0 : index
    %0 = vector.load %arg1[%c0, %c0_0, %c0_1] : memref<9x128x128xbf16, #tpu.memory_space<vmem>>, vector<9x128x128xbf16>
    %cst = arith.constant dense<0xFF80> : vector<128x128xbf16>
    %1 = vector.multi_reduction <maximumf>, %0, %cst [0] : vector<9x128x128xbf16> to vector<128x128xbf16>
    %c0_2 = arith.constant 0 : index
    %c0_3 = arith.constant 0 : index
    %2 = vector.load %arg2[%c0_2, %c0_3] : memref<128x128xbf16, #tpu.memory_space<vmem>>, vector<128x128xbf16>
    tpu.vector_store %arg2[%c0_2, %c0_3], %1 {strides = array<i32>} : memref<128x128xbf16, #tpu.memory_space<vmem>>, vector<128x128xbf16>,
    return
  }
  func.func @transform_0(%arg0: i32) -> (i32, i32, i32) {
    %c0_i32 = arith.constant 0 : i32
    %c0_i32_0 = arith.constant 0 : i32
    %c0_i32_1 = arith.constant 0 : i32
    return %c0_i32, %arg0, %c0_i32_0 : i32, i32, i32
  }
  func.func @transform_1(%arg0: i32) -> (i32, i32) {
    %c0_i32 = arith.constant 0 : i32
    %c0_i32_0 = arith.constant 0 : i32
    return %arg0, %c0_i32 : i32, i32
  }
}

</mosaic_0001>

<bundles_post_ra>
// kernel: stem_forward.2
= control target key start
LH: loop header
LB: loop body
LE: loop exit
PB: predicated region body
PF: predicated region fallthrough
CT: control target
= control target key end

     0   :  { %s1363_s12 = smov 0   ;;  %s1365_s13 = smov 0   ;;  %s1572_s0 = inlined_call_operand.vmem [shape: bf16[512,256], index: 0, kind: input, shape index: {}]   ;;  %s1573_s1 = inlined_call_operand.vmem [shape: bf16[256,128], index: 1, kind: input, shape index: {}]   ;;  %s1574_s2 = inlined_call_operand.vmem [shape: f32[1,128], index: 2, kind: input, shape index: {}]   ;;  %s1575_s3 = inlined_call_operand.vmem [shape: bf16[512,128], index: 3, kind: output, shape index: {}]  }
   0x1   :  { %s1367_s14 = smov 0  }
   0x2 LB: > { %s25_s15 = sadd.s32 1, %s1337_s13  ;;  %p934_p0 = scmp.ge.s32.totalorder %s1341_s14, 1  ;;  %s1341_s14 = sphi %s1367_s14, %s13_s14   ;;  %s1337_s13 = sphi %s1365_s13, %s1577_s13   ;;  %s1333_s12 = sphi %s1363_s12, %s1576_s12  }
   0x3   : > { %p27_p1 = scmp.ge.s32.totalorder %s25_s15, 2  ;;  %p170_p2 = scmp.lt.s32.totalorder %s1341_s14, 3 }
   0x5   : > { %s1579_s15 = smov (%p27_p1, %s25_s15), 0  ;;  %p171_p3 = pnand %p934_p0, %p170_p2 }
   0x6   : > { %s935_s28 = sshll.u32 (!%p171_p3), %s1333_s12, 5 }
   0x7   : > { %174 = sbr.rel (%p171_p3) target bundleno = 305 (0x131), region = 32  ;;  %p206_p4 = scmp.lt.s32.totalorder (!%p171_p3), %s935_s28, 63 }
   0xc   : > { %v1174_v0 = vld [vmem:[%s1573_s1 + $0x38] sm:$0xff]  ;;  %v1173_v2 = vld [vmem:[%s1573_s1 + $0x30] sm:$0xff]  ;;  %v1172_v4 = vld [vmem:[%s1573_s1 + $0x28] sm:$0xff]  ;;  %s1581_s28 = smov (!%p206_p4, %s935_s28), 63 }
   0xd   : > { %v1182_v1 = vld [vmem:[%s1573_s1 + $0x78] sm:$0xff]  ;;  %552 = vmatpush.bf16.msra.mxu0 %v1174_v0  ;;  %1278 = vmatpush.bf16.msra.mxu2 %v1174_v0  ;;  %v1181_v3 = vld [vmem:[%s1573_s1 + $0x70] sm:$0xff]  ;;  %v1180_v5 = vld [vmem:[%s1573_s1 + $0x68] sm:$0xff]  ;;  %s1134_s17 = sshll.u32 %s1581_s28, 3  ;;  %s939_s5 = sshll.u32 %s1581_s28, 2 }
   0xe   : > { %641 = vmatpush.bf16.msra.mxu1 %v1182_v1  ;;  %1286 = vmatpush.bf16.msra.mxu3 %v1182_v1  ;;  %v1171_v6 = vld [vmem:[%s1573_s1 + $0x20] sm:$0xff]  ;;  %v1170_v8 = vld [vmem:[%s1573_s1 + $0x18] sm:$0xff]  ;;  %v1169_v10 = vld [vmem:[%s1573_s1 + $0x10] sm:$0xff]  ;;  %s1429_s22 = scalar_lea.vmem %s1572_s0, %s1134_s17  ;;  %s1516_s8 = scalar_lea.vmem %s1575_s3, %s939_s5 }
   0xf   : > { %v1179_v7 = vld [vmem:[%s1573_s1 + $0x60] sm:$0xff]  ;;  %v1178_v9 = vld [vmem:[%s1573_s1 + $0x58] sm:$0xff]  ;;  %v1177_v11 = vld [vmem:[%s1573_s1 + $0x50] sm:$0xff] }
  0x10   : > { %v1168_v12 = vld [vmem:[%s1573_s1 + $0x8] sm:$0xff]  ;;  %v1167_v14 = vld [vmem:[%s1573_s1] sm:$0xff]  ;;  %v950_v28 = vld [vmem:[%s1429_s22 + $0x10] sm:$0xf] }
  0x11   : > { %553 = vmatpush.bf16.msra.mxu0 %v1173_v2  ;;  %1279 = vmatpush.bf16.msra.mxu2 %v1173_v2  ;;  %v1176_v13 = vld [vmem:[%s1573_s1 + $0x48] sm:$0xff]  ;;  %v1175_v15 = vld [vmem:[%s1573_s1 + $0x40] sm:$0xff]  ;;  %v1138_v29 = vld [vmem:[%s1429_s22 + $0x14] sm:$0xf0] }
  0x12   : > { %642 = vmatpush.bf16.msra.mxu1 %v1181_v3  ;;  %1287 = vmatpush.bf16.msra.mxu3 %v1181_v3  ;;  %v942_v16 = vld [vmem:[%s1429_s22] sm:$0xf]  ;;  %v1136_v17 = vld [vmem:[%s1429_s22 + $0x4] sm:$0xf0]  ;;  %v1135_v20 = vld [vmem:[%s1429_s22 + $0x4] sm:$0xf]  ;;  %v951_v36 = vor.u32 %v1138_v29, %v950_v28 }
  0x13   : > { %v1006_v18 = vld [vmem:[%s1429_s22 + $0x80] sm:$0xf]  ;;  %v1152_v19 = vld [vmem:[%s1429_s22 + $0x84] sm:$0xf0]  ;;  %v944_v21 = vld [vmem:[%s1429_s22 + $0x8] sm:$0xf0]  ;;  %v943_v24 = vor.u32 %v1136_v17, %v942_v16 }
  0x14   : > { %v1151_v22 = vld [vmem:[%s1429_s22 + $0x84] sm:$0xf]  ;;  %v1008_v23 = vld [vmem:[%s1429_s22 + $0x88] sm:$0xf0]  ;;  %v1007_v25 = vor.u32 %v1152_v19, %v1006_v18  ;;  %v947_v26 = vor.u32 %v1135_v20, %v944_v21  ;;  %v1014_v30 = vld [vmem:[%s1429_s22 + $0x90] sm:$0xf] }
  0x15   : > { %554 = vmatpush.bf16.msra.mxu0 %v1172_v4  ;;  %1280 = vmatpush.bf16.msra.mxu2 %v1172_v4  ;;  %v1011_v27 = vor.u32 %v1151_v22, %v1008_v23  ;;  %v1154_v31 = vld [vmem:[%s1429_s22 + $0x94] sm:$0xf0]  ;;  %v1137_v32 = vld [vmem:[%s1429_s22 + $0x14] sm:$0xf]  ;;  %v952_v33 = vld [vmem:[%s1429_s22 + $0x18] sm:$0xf0] }
  0x16   : > { %643 = vmatpush.bf16.msra.mxu1 %v1180_v5  ;;  %1288 = vmatpush.bf16.msra.mxu3 %v1180_v5  ;;  %v1153_v34 = vld [vmem:[%s1429_s22 + $0x94] sm:$0xf]  ;;  %v1016_v35 = vld [vmem:[%s1429_s22 + $0x98] sm:$0xf0]  ;;  %v1015_v37 = vor.u32 %v1154_v31, %v1014_v30  ;;  %v955_v38 = vor.u32 %v1137_v32, %v952_v33  ;;  %v958_v40 = vld [vmem:[%s1429_s22 + $0x20] sm:$0xf] }
  0x17   : > { %v1019_v39 = vor.u32 %v1153_v34, %v1016_v35  ;;  %v1140_v41 = vld [vmem:[%s1429_s22 + $0x24] sm:$0xf0]  ;;  %v1022_v42 = vld [vmem:[%s1429_s22 + $0xa0] sm:$0xf]  ;;  %v1139_v44 = vld [vmem:[%s1429_s22 + $0x24] sm:$0xf] }
  0x18   : > { %v1156_v43 = vld [vmem:[%s1429_s22 + $0xa4] sm:$0xf0]  ;;  %v960_v45 = vld [vmem:[%s1429_s22 + $0x28] sm:$0xf0]  ;;  %v1155_v46 = vld [vmem:[%s1429_s22 + $0xa4] sm:$0xf]  ;;  %v959_v48 = vor.u32 %v1140_v41, %v958_v40 }
  0x19   : > { %555 = vmatpush.bf16.msra.mxu0 %v1171_v6  ;;  %1281 = vmatpush.bf16.msra.mxu2 %v1171_v6  ;;  %v1024_v47 = vld [vmem:[%s1429_s22 + $0xa8] sm:$0xf0]  ;;  %v1023_v49 = vor.u32 %v1156_v43, %v1022_v42  ;;  %v963_v50 = vor.u32 %v1139_v44, %v960_v45  ;;  %v966_v52 = vld [vmem:[%s1429_s22 + $0x30] sm:$0xf]  ;;  %v1142_v53 = vld [vmem:[%s1429_s22 + $0x34] sm:$0xf0] }
  0x1a   : > { %644 = vmatpush.bf16.msra.mxu1 %v1179_v7  ;;  %1289 = vmatpush.bf16.msra.mxu3 %v1179_v7  ;;  %v1027_v51 = vor.u32 %v1155_v46, %v1024_v47  ;;  %v1030_v54 = vld [vmem:[%s1429_s22 + $0xb0] sm:$0xf]  ;;  %v1158_v55 = vld [vmem:[%s1429_s22 + $0xb4] sm:$0xf0]  ;;  %v1141_v56 = vld [vmem:[%s1429_s22 + $0x34] sm:$0xf]  ;;  %v967_v60 = vor.u32 %v1142_v53, %v966_v52 }
  0x1b   : > { %v968_v57 = vld [vmem:[%s1429_s22 + $0x38] sm:$0xf0]  ;;  %v1157_v58 = vld [vmem:[%s1429_s22 + $0xb4] sm:$0xf]  ;;  %v1031_v61 = vor.u32 %v1158_v55, %v1030_v54  ;;  %v974_v0 = vld [vmem:[%s1429_s22 + $0x40] sm:$0xf] }
  0x1c   : > { %v1032_v59 = vld [vmem:[%s1429_s22 + $0xb8] sm:$0xf0]  ;;  %v971_v62 = vor.u32 %v1141_v56, %v968_v57  ;;  %v1144_v1 = vld [vmem:[%s1429_s22 + $0x44] sm:$0xf0]  ;;  %v1038_v2 = vld [vmem:[%s1429_s22 + $0xc0] sm:$0xf] }
  0x1d   : > { %556 = vmatpush.bf16.msra.mxu0 %v1170_v8  ;;  %1282 = vmatpush.bf16.msra.mxu2 %v1170_v8  ;;  %v1035_v63 = vor.u32 %v1157_v58, %v1032_v59  ;;  %v1160_v3 = vld [vmem:[%s1429_s22 + $0xc4] sm:$0xf0]  ;;  %v1143_v4 = vld [vmem:[%s1429_s22 + $0x44] sm:$0xf]  ;;  %v976_v5 = vld [vmem:[%s1429_s22 + $0x48] sm:$0xf0]  ;;  %v975_v8 = vor.u32 %v1144_v1, %v974_v0 }
  0x1e   : > { %645 = vmatpush.bf16.msra.mxu1 %v1178_v9  ;;  %1290 = vmatpush.bf16.msra.mxu3 %v1178_v9  ;;  %v1159_v6 = vld [vmem:[%s1429_s22 + $0xc4] sm:$0xf]  ;;  %v1040_v7 = vld [vmem:[%s1429_s22 + $0xc8] sm:$0xf0]  ;;  %v1039_v9 = vor.u32 %v1160_v3, %v1038_v2  ;;  %v1145_v16 = vld [vmem:[%s1429_s22 + $0x54] sm:$0xf] }
  0x1f   : > { %v984_v17 = vld [vmem:[%s1429_s22 + $0x58] sm:$0xf0]  ;;  %v1161_v18 = vld [vmem:[%s1429_s22 + $0xd4] sm:$0xf]  ;;  %v1147_v28 = vld [vmem:[%s1429_s22 + $0x64] sm:$0xf] }
  0x20   : > { %v1048_v19 = vld [vmem:[%s1429_s22 + $0xd8] sm:$0xf0]  ;;  %v987_v22 = vor.u32 %v1145_v16, %v984_v17  ;;  %v992_v29 = vld [vmem:[%s1429_s22 + $0x68] sm:$0xf0]  ;;  %v1163_v30 = vld [vmem:[%s1429_s22 + $0xe4] sm:$0xf] }
  0x21   : > { %557 = vmatpush.bf16.msra.mxu0 %v1169_v10  ;;  %1283 = vmatpush.bf16.msra.mxu2 %v1169_v10  ;;  %v979_v10 = vor.u32 %v1143_v4, %v976_v5  ;;  %v1051_v23 = vor.u32 %v1161_v18, %v1048_v19  ;;  %v1056_v31 = vld [vmem:[%s1429_s22 + $0xe8] sm:$0xf0]  ;;  %v995_v34 = vor.u32 %v1147_v28, %v992_v29  ;;  %v1149_v40 = vld [vmem:[%s1429_s22 + $0x74] sm:$0xf]  ;;  %v1000_v41 = vld [vmem:[%s1429_s22 + $0x78] sm:$0xf0] }
  0x22   : > { %646 = vmatpush.bf16.msra.mxu1 %v1177_v11  ;;  %1291 = vmatpush.bf16.msra.mxu3 %v1177_v11  ;;  %v1043_v11 = vor.u32 %v1159_v6, %v1040_v7  ;;  %v1059_v35 = vor.u32 %v1163_v30, %v1056_v31  ;;  %v1165_v42 = vld [vmem:[%s1429_s22 + $0xf4] sm:$0xf]  ;;  %v1064_v43 = vld [vmem:[%s1429_s22 + $0xf8] sm:$0xf0]  ;;  %v1003_v46 = vor.u32 %v1149_v40, %v1000_v41 }
  0x23   : > { %v1067_v47 = vor.u32 %v1165_v42, %v1064_v43 }
  0x25   : > { %558 = vmatpush.bf16.msra.mxu0 %v1168_v12  ;;  %1284 = vmatpush.bf16.msra.mxu2 %v1168_v12  ;;  %v982_v12 = vld [vmem:[%s1429_s22 + $0x50] sm:$0xf] }
  0x26   : > { %647 = vmatpush.bf16.msra.mxu1 %v1176_v13  ;;  %1292 = vmatpush.bf16.msra.mxu3 %v1176_v13  ;;  %v1146_v13 = vld [vmem:[%s1429_s22 + $0x54] sm:$0xf0] }
  0x27   : > { %v983_v20 = vor.u32 %v1146_v13, %v982_v12 }
  0x29   : > { %559 = vmatpush.bf16.msra.mxu0 %v1167_v14  ;;  %1285 = vmatpush.bf16.msra.mxu2 %v1167_v14  ;;  %v1046_v14 = vld [vmem:[%s1429_s22 + $0xd0] sm:$0xf] }
  0x2a   : > { %648 = vmatpush.bf16.msra.mxu1 %v1175_v15  ;;  %1293 = vmatpush.bf16.msra.mxu3 %v1175_v15  ;;  %v1162_v15 = vld [vmem:[%s1429_s22 + $0xd4] sm:$0xf0] }
  0x2b   : > { %v1047_v21 = vor.u32 %v1162_v15, %v1046_v14 }
  0x2c   : > { %560 = vmatmul.bf16.vlgmr.msra.gmra.mxu0 %v943_v24  ;;  %600 = vmatmul.bf16.vlgmr.msra.gmra.mxu2 %v1007_v25  ;;  %v990_v24 = vld [vmem:[%s1429_s22 + $0x60] sm:$0xf]  ;;  %v1148_v25 = vld [vmem:[%s1429_s22 + $0x64] sm:$0xf0] }
  0x2d   : > { %649 = vmatmul.bf16.vlgmr.msra.gmra.mxu1 %v947_v26  ;;  %689 = vmatmul.bf16.vlgmr.msra.gmra.mxu3 %v1011_v27  ;;  %v1054_v26 = vld [vmem:[%s1429_s22 + $0xe0] sm:$0xf]  ;;  %v1164_v27 = vld [vmem:[%s1429_s22 + $0xe4] sm:$0xf0]  ;;  %v991_v32 = vor.u32 %v1148_v25, %v990_v24 }
  0x2e   : > { %v1055_v33 = vor.u32 %v1164_v27, %v1054_v26 }
  0x3c   : > { %565 = vmatmul.bf16.gmra.mxu0 %v951_v36  ;;  %605 = vmatmul.bf16.gmra.mxu2 %v1015_v37  ;;  %v998_v36 = vld [vmem:[%s1429_s22 + $0x70] sm:$0xf]  ;;  %v1150_v37 = vld [vmem:[%s1429_s22 + $0x74] sm:$0xf0] }
  0x3d   : > { %654 = vmatmul.bf16.gmra.mxu1 %v955_v38  ;;  %694 = vmatmul.bf16.gmra.mxu3 %v1019_v39  ;;  %v1062_v38 = vld [vmem:[%s1429_s22 + $0xf0] sm:$0xf]  ;;  %v1166_v39 = vld [vmem:[%s1429_s22 + $0xf4] sm:$0xf0]  ;;  %v999_v44 = vor.u32 %v1150_v37, %v998_v36 }
  0x3e   : > { %v1063_v45 = vor.u32 %v1166_v39, %v1062_v38 }
  0x4c   : > { %570 = vmatmul.bf16.gmra.mxu0 %v959_v48  ;;  %610 = vmatmul.bf16.gmra.mxu2 %v1023_v49  ;;  %v1507_v49 = vld [vmem:[%s1574_s2] ss:$0 sm:$0xff] }
  0x4d   : > { %659 = vmatmul.bf16.gmra.mxu1 %v963_v50  ;;  %699 = vmatmul.bf16.gmra.mxu3 %v1027_v51 }
  0x5c   : > { %575 = vmatmul.bf16.gmra.mxu0 %v967_v60  ;;  %615 = vmatmul.bf16.gmra.mxu2 %v1031_v61 }
  0x5d   : > { %664 = vmatmul.bf16.gmra.mxu1 %v971_v62  ;;  %704 = vmatmul.bf16.gmra.mxu3 %v1035_v63 }
  0x6c   : > { %580 = vmatmul.bf16.gmra.mxu0 %v975_v8  ;;  %620 = vmatmul.bf16.gmra.mxu2 %v1039_v9 }
  0x6d   : > { %669 = vmatmul.bf16.gmra.mxu1 %v979_v10  ;;  %709 = vmatmul.bf16.gmra.mxu3 %v1043_v11 }
  0x7c   : > { %585 = vmatmul.bf16.gmra.mxu0 %v983_v20  ;;  %625 = vmatmul.bf16.gmra.mxu2 %v1047_v21 }
  0x7d   : > { %674 = vmatmul.bf16.gmra.mxu1 %v987_v22  ;;  %714 = vmatmul.bf16.gmra.mxu3 %v1051_v23 }
  0x8c   : > { %590 = vmatmul.bf16.gmra.mxu0 %v991_v32  ;;  %630 = vmatmul.bf16.gmra.mxu2 %v1055_v33 }
  0x8d   : > { %679 = vmatmul.bf16.gmra.mxu1 %v995_v34  ;;  %719 = vmatmul.bf16.gmra.mxu3 %v1059_v35 }
  0x9c   : > { %595 = vmatmul.bf16.gmra.mxu0 %v999_v44  ;;  %635 = vmatmul.bf16.gmra.mxu2 %v1063_v45 }
  0x9d   : > { %684 = vmatmul.bf16.gmra.mxu1 %v1003_v46  ;;  %724 = vmatmul.bf16.gmra.mxu3 %v1067_v47 }
  0xa9   : > { %v561_v48 = vpop.f32.mrf.mxu0 }
  0xaa   : > { %v650_v50 = vpop.f32.mrf.mxu1  ;;  %v562_v51 = vadd.f32 %v1507_v49, %v561_v48 }
  0xac   : > { %v651_v55 = vadd.f32 %v650_v50, %v562_v51 }
  0xae   : > { %v730_v60 = vmax.f32 %v651_v55, 0.0 }
  0xaf   : > { %v601_v52 = vpop.f32.mrf.mxu2 }
  0xb0   : > { %v690_v53 = vpop.f32.mrf.mxu3  ;;  %v602_v58 = vadd.f32 %v1507_v49, %v601_v52 }
  0xb1   : > { %v563_v54 = vpop.f32.mrf.mxu0 }
  0xb2   : > { %v564_v56 = vadd.f32 %v1507_v49, %v563_v54  ;;  %v652_v57 = vpop.f32.mrf.mxu1  ;;  %v691_v63 = vadd.f32 %v690_v53, %v602_v58 }
  0xb4   : > { %v653_v59 = vadd.f32 %v652_v57, %v564_v56  ;;  %v746_v6 = vmax.f32 %v691_v63, 0.0 }
  0xb6   : > { %v731_v61 = vmax.f32 %v653_v59, 0.0 }
  0xb7   : > { %v603_v62 = vpop.f32.mrf.mxu2 }
  0xb8   : > { %v1186_v0 = vpack.c.bf16 %v731_v61, %v730_v60  ;;  %v604_v1 = vadd.f32 %v1507_v49, %v603_v62  ;;  %v692_v2 = vpop.f32.mrf.mxu3 }
  0xb9   : > { %v566_v3 = vpop.f32.mrf.mxu0 }
  0xba   : > { %1187 = vst [vmem:[%s1516_s8] sm:$0xff] %v1186_v0   ;;  %v693_v4 = vadd.f32 %v692_v2, %v604_v1  ;;  %v655_v5 = vpop.f32.mrf.mxu1  ;;  %v567_v9 = vadd.f32 %v1507_v49, %v566_v3 }
  0xbc   : > { %v747_v7 = vmax.f32 %v693_v4, 0.0  ;;  %v656_v13 = vadd.f32 %v655_v5, %v567_v9 }
  0xbe   : > { %v1226_v8 = vpack.c.bf16 %v747_v7, %v746_v6  ;;  %v732_v18 = vmax.f32 %v656_v13, 0.0 }
  0xbf   : > { %v606_v10 = vpop.f32.mrf.mxu2 }
  0xc0   : > { %1270 = vst [vmem:[%s1516_s8 + $0x40] sm:$0xff] %v1226_v8   ;;  %v695_v11 = vpop.f32.mrf.mxu3  ;;  %v607_v16 = vadd.f32 %v1507_v49, %v606_v10 }
  0xc1   : > { %v568_v12 = vpop.f32.mrf.mxu0 }
  0xc2   : > { %v569_v14 = vadd.f32 %v1507_v49, %v568_v12  ;;  %v657_v15 = vpop.f32.mrf.mxu1  ;;  %v696_v21 = vadd.f32 %v695_v11, %v607_v16 }
  0xc4   : > { %v658_v17 = vadd.f32 %v657_v15, %v569_v14  ;;  %v748_v28 = vmax.f32 %v696_v21, 0.0 }
  0xc6   : > { %v733_v19 = vmax.f32 %v658_v17, 0.0 }
  0xc7   : > { %v608_v20 = vpop.f32.mrf.mxu2 }
  0xc8   : > { %v1191_v22 = vpack.c.bf16 %v733_v19, %v732_v18  ;;  %v609_v23 = vadd.f32 %v1507_v49, %v608_v20  ;;  %v697_v24 = vpop.f32.mrf.mxu3 }
  0xc9   : > { %v571_v25 = vpop.f32.mrf.mxu0 }
  0xca   : > { %1263 = vst [vmem:[%s1516_s8 + $0x8] sm:$0xff] %v1191_v22   ;;  %v698_v26 = vadd.f32 %v697_v24, %v609_v23  ;;  %v660_v27 = vpop.f32.mrf.mxu1  ;;  %v572_v31 = vadd.f32 %v1507_v49, %v571_v25 }
  0xcc   : > { %v749_v29 = vmax.f32 %v698_v26, 0.0  ;;  %v661_v35 = vadd.f32 %v660_v27, %v572_v31 }
  0xce   : > { %v1231_v30 = vpack.c.bf16 %v749_v29, %v748_v28  ;;  %v734_v40 = vmax.f32 %v661_v35, 0.0 }
  0xcf   : > { %v611_v32 = vpop.f32.mrf.mxu2 }
  0xd0   : > { %1271 = vst [vmem:[%s1516_s8 + $0x48] sm:$0xff] %v1231_v30   ;;  %v700_v33 = vpop.f32.mrf.mxu3  ;;  %v612_v38 = vadd.f32 %v1507_v49, %v611_v32 }
  0xd1   : > { %v573_v34 = vpop.f32.mrf.mxu0 }
  0xd2   : > { %v574_v36 = vadd.f32 %v1507_v49, %v573_v34  ;;  %v662_v37 = vpop.f32.mrf.mxu1  ;;  %v701_v43 = vadd.f32 %v700_v33, %v612_v38 }
  0xd4   : > { %v663_v39 = vadd.f32 %v662_v37, %v574_v36  ;;  %v750_v51 = vmax.f32 %v701_v43, 0.0 }
  0xd6   : > { %v735_v41 = vmax.f32 %v663_v39, 0.0 }
  0xd7   : > { %v613_v42 = vpop.f32.mrf.mxu2 }
  0xd8   : > { %v1196_v44 = vpack.c.bf16 %v735_v41, %v734_v40  ;;  %v614_v45 = vadd.f32 %v1507_v49, %v613_v42  ;;  %v702_v46 = vpop.f32.mrf.mxu3 }
  0xd9   : > { %v576_v47 = vpop.f32.mrf.mxu0 }
  0xda   : > { %1264 = vst [vmem:[%s1516_s8 + $0x10] sm:$0xff] %v1196_v44   ;;  %v703_v48 = vadd.f32 %v702_v46, %v614_v45  ;;  %v665_v50 = vpop.f32.mrf.mxu1  ;;  %v577_v54 = vadd.f32 %v1507_v49, %v576_v47 }
  0xdc   : > { %v751_v52 = vmax.f32 %v703_v48, 0.0  ;;  %v666_v58 = vadd.f32 %v665_v50, %v577_v54 }
  0xde   : > { %v1236_v53 = vpack.c.bf16 %v751_v52, %v750_v51  ;;  %v736_v63 = vmax.f32 %v666_v58, 0.0 }
  0xdf   : > { %v616_v55 = vpop.f32.mrf.mxu2 }
  0xe0   : > { %1272 = vst [vmem:[%s1516_s8 + $0x50] sm:$0xff] %v1236_v53   ;;  %v705_v56 = vpop.f32.mrf.mxu3  ;;  %v617_v61 = vadd.f32 %v1507_v49, %v616_v55 }
  0xe1   : > { %v578_v57 = vpop.f32.mrf.mxu0 }
  0xe2   : > { %v579_v59 = vadd.f32 %v1507_v49, %v578_v57  ;;  %v667_v60 = vpop.f32.mrf.mxu1  ;;  %v706_v2 = vadd.f32 %v705_v56, %v617_v61 }
  0xe4   : > { %v668_v62 = vadd.f32 %v667_v60, %v579_v59  ;;  %v752_v9 = vmax.f32 %v706_v2, 0.0 }
  0xe6   : > { %v737_v0 = vmax.f32 %v668_v62, 0.0 }
  0xe7   : > { %v618_v1 = vpop.f32.mrf.mxu2 }
  0xe8   : > { %v1201_v3 = vpack.c.bf16 %v737_v0, %v736_v63  ;;  %v619_v4 = vadd.f32 %v1507_v49, %v618_v1  ;;  %v707_v5 = vpop.f32.mrf.mxu3 }
  0xe9   : > { %v581_v6 = vpop.f32.mrf.mxu0 }
  0xea   : > { %1265 = vst [vmem:[%s1516_s8 + $0x18] sm:$0xff] %v1201_v3   ;;  %v708_v7 = vadd.f32 %v707_v5, %v619_v4  ;;  %v670_v8 = vpop.f32.mrf.mxu1  ;;  %v582_v12 = vadd.f32 %v1507_v49, %v581_v6 }
  0xec   : > { %v753_v10 = vmax.f32 %v708_v7, 0.0  ;;  %v671_v16 = vadd.f32 %v670_v8, %v582_v12 }
  0xee   : > { %v1241_v11 = vpack.c.bf16 %v753_v10, %v752_v9  ;;  %v738_v21 = vmax.f32 %v671_v16, 0.0 }
  0xef   : > { %v621_v13 = vpop.f32.mrf.mxu2 }
  0xf0   : > { %1273 = vst [vmem:[%s1516_s8 + $0x58] sm:$0xff] %v1241_v11   ;;  %v710_v14 = vpop.f32.mrf.mxu3  ;;  %v622_v19 = vadd.f32 %v1507_v49, %v621_v13 }
  0xf1   : > { %v583_v15 = vpop.f32.mrf.mxu0 }
  0xf2   : > { %v584_v17 = vadd.f32 %v1507_v49, %v583_v15  ;;  %v672_v18 = vpop.f32.mrf.mxu1  ;;  %v711_v24 = vadd.f32 %v710_v14, %v622_v19 }
  0xf4   : > { %v673_v20 = vadd.f32 %v672_v18, %v584_v17  ;;  %v754_v31 = vmax.f32 %v711_v24, 0.0 }
  0xf6   : > { %v739_v22 = vmax.f32 %v673_v20, 0.0 }
  0xf7   : > { %v623_v23 = vpop.f32.mrf.mxu2 }
  0xf8   : > { %v1206_v25 = vpack.c.bf16 %v739_v22, %v738_v21  ;;  %v624_v26 = vadd.f32 %v1507_v49, %v623_v23  ;;  %v712_v27 = vpop.f32.mrf.mxu3 }
  0xf9   : > { %v586_v28 = vpop.f32.mrf.mxu0 }
  0xfa   : > { %1266 = vst [vmem:[%s1516_s8 + $0x20] sm:$0xff] %v1206_v25   ;;  %v713_v29 = vadd.f32 %v712_v27, %v624_v26  ;;  %v675_v30 = vpop.f32.mrf.mxu1  ;;  %v587_v34 = vadd.f32 %v1507_v49, %v586_v28 }
  0xfc   : > { %v755_v32 = vmax.f32 %v713_v29, 0.0  ;;  %v676_v38 = vadd.f32 %v675_v30, %v587_v34 }
  0xfe   : > { %v1246_v33 = vpack.c.bf16 %v755_v32, %v754_v31  ;;  %v740_v43 = vmax.f32 %v676_v38, 0.0 }
  0xff   : > { %v626_v35 = vpop.f32.mrf.mxu2 }
 0x100   : > { %1274 = vst [vmem:[%s1516_s8 + $0x60] sm:$0xff] %v1246_v33   ;;  %v715_v36 = vpop.f32.mrf.mxu3  ;;  %v627_v41 = vadd.f32 %v1507_v49, %v626_v35 }
 0x101   : > { %v588_v37 = vpop.f32.mrf.mxu0 }
 0x102   : > { %v589_v39 = vadd.f32 %v1507_v49, %v588_v37  ;;  %v677_v40 = vpop.f32.mrf.mxu1  ;;  %v716_v46 = vadd.f32 %v715_v36, %v627_v41 }
 0x104   : > { %v678_v42 = vadd.f32 %v677_v40, %v589_v39  ;;  %v756_v54 = vmax.f32 %v716_v46, 0.0 }
 0x106   : > { %v741_v44 = vmax.f32 %v678_v42, 0.0 }
 0x107   : > { %v628_v45 = vpop.f32.mrf.mxu2 }
 0x108   : > { %v1211_v47 = vpack.c.bf16 %v741_v44, %v740_v43  ;;  %v629_v48 = vadd.f32 %v1507_v49, %v628_v45  ;;  %v717_v50 = vpop.f32.mrf.mxu3 }
 0x109   : > { %v591_v51 = vpop.f32.mrf.mxu0 }
 0x10a   : > { %1267 = vst [vmem:[%s1516_s8 + $0x28] sm:$0xff] %v1211_v47   ;;  %v718_v52 = vadd.f32 %v717_v50, %v629_v48  ;;  %v680_v53 = vpop.f32.mrf.mxu1  ;;  %v592_v57 = vadd.f32 %v1507_v49, %v591_v51 }
 0x10c   : > { %v757_v55 = vmax.f32 %v718_v52, 0.0  ;;  %v681_v61 = vadd.f32 %v680_v53, %v592_v57 }
 0x10e   : > { %v1251_v56 = vpack.c.bf16 %v757_v55, %v756_v54  ;;  %v742_v2 = vmax.f32 %v681_v61, 0.0 }
 0x10f   : > { %v631_v58 = vpop.f32.mrf.mxu2 }
 0x110   : > { %1275 = vst [vmem:[%s1516_s8 + $0x68] sm:$0xff] %v1251_v56   ;;  %v720_v59 = vpop.f32.mrf.mxu3  ;;  %v632_v0 = vadd.f32 %v1507_v49, %v631_v58 }
 0x111   : > { %v593_v60 = vpop.f32.mrf.mxu0 }
 0x112   : > { %v594_v62 = vadd.f32 %v1507_v49, %v593_v60  ;;  %v682_v63 = vpop.f32.mrf.mxu1  ;;  %v721_v5 = vadd.f32 %v720_v59, %v632_v0 }
 0x114   : > { %v683_v1 = vadd.f32 %v682_v63, %v594_v62  ;;  %v758_v12 = vmax.f32 %v721_v5, 0.0 }
 0x116   : > { %v743_v3 = vmax.f32 %v683_v1, 0.0 }
 0x117   : > { %v633_v4 = vpop.f32.mrf.mxu2 }
 0x118   : > { %v1216_v6 = vpack.c.bf16 %v743_v3, %v742_v2  ;;  %v634_v7 = vadd.f32 %v1507_v49, %v633_v4  ;;  %v722_v8 = vpop.f32.mrf.mxu3 }
 0x119   : > { %v596_v9 = vpop.f32.mrf.mxu0 }
 0x11a   : > { %1268 = vst [vmem:[%s1516_s8 + $0x30] sm:$0xff] %v1216_v6   ;;  %v723_v10 = vadd.f32 %v722_v8, %v634_v7  ;;  %v685_v11 = vpop.f32.mrf.mxu1  ;;  %v597_v15 = vadd.f32 %v1507_v49, %v596_v9 }
 0x11c   : > { %v759_v13 = vmax.f32 %v723_v10, 0.0  ;;  %v686_v19 = vadd.f32 %v685_v11, %v597_v15 }
 0x11e   : > { %v1256_v14 = vpack.c.bf16 %v759_v13, %v758_v12  ;;  %v744_v24 = vmax.f32 %v686_v19, 0.0 }
 0x11f   : > { %v636_v16 = vpop.f32.mrf.mxu2 }
 0x120   : > { %1276 = vst [vmem:[%s1516_s8 + $0x70] sm:$0xff] %v1256_v14   ;;  %v725_v17 = vpop.f32.mrf.mxu3  ;;  %v637_v22 = vadd.f32 %v1507_v49, %v636_v16 }
 0x121   : > { %v598_v18 = vpop.f32.mrf.mxu0 }
 0x122   : > { %v599_v20 = vadd.f32 %v1507_v49, %v598_v18  ;;  %v687_v21 = vpop.f32.mrf.mxu1  ;;  %v726_v27 = vadd.f32 %v725_v17, %v637_v22 }
 0x124   : > { %v688_v23 = vadd.f32 %v687_v21, %v599_v20  ;;  %v760_v32 = vmax.f32 %v726_v27, 0.0 }
 0x126   : > { %v745_v25 = vmax.f32 %v688_v23, 0.0 }
 0x127   : > { %v638_v26 = vpop.f32.mrf.mxu2 }
 0x128   : > { %v1221_v28 = vpack.c.bf16 %v745_v25, %v744_v24  ;;  %v639_v29 = vadd.f32 %v1507_v49, %v638_v26  ;;  %v727_v30 = vpop.f32.mrf.mxu3 }
 0x12a   : > { %1269 = vst [vmem:[%s1516_s8 + $0x38] sm:$0xff] %v1221_v28   ;;  %v728_v31 = vadd.f32 %v727_v30, %v639_v29 }
 0x12c   : > { %v761_v33 = vmax.f32 %v728_v31, 0.0 }
 0x12e   : > { %v1261_v34 = vpack.c.bf16 %v761_v33, %v760_v32 }
 0x130   : > { %1277 = vst [vmem:[%s1516_s8 + $0x78] sm:$0xff] %v1261_v34  }
 0x131 PF: > { %s13_s14 = sadd.s32 1, %s1341_s14   ;;  %s1576_s12 = smov %s1337_s13 }
 0x132   : > { %p10_p5 = scmp.ge.s32.totalorder %s13_s14, 4   ;;  %s1577_s13 = smov %s1579_s15 }
 0x134   :  { %12 = sbr.rel (!%p10_p5) target bundleno = 2 (0x2), region = 68 }

// kernel: stem_forward.3
= control target key start
LH: loop header
LB: loop body
LE: loop exit
PB: predicated region body
PF: predicated region fallthrough
CT: control target
= control target key end

     0   :  { %s1142_s0 = inlined_call_operand.vmem [shape: bf16[9,128,128], index: 0, kind: input, shape index: {}]   ;;  %s1143_s1 = inlined_call_operand.hbm [shape: bf16[128,128], index: 1, kind: output, shape index: {}]  }
   0x1   :  { %v476_v0 = vld [vmem:[%s1142_s0] sm:$0xff]   ;;  %v803_v16 = vld [vmem:[%s1142_s0 + $0x8] sm:$0xff]   ;;  %v804_v56 = vld [vmem:[%s1142_s0 + $0x10] sm:$0xff]  }
   0x2   :  { %v810_v1 = vld [vmem:[%s1142_s0 + $0x40] sm:$0xff]   ;;  %v477_v3 = vunpack.c.l.bf16 %v476_v0  ;;  %v478_v4 = vunpack.c.h.bf16 %v476_v0  ;;  %v811_v17 = vld [vmem:[%s1142_s0 + $0x48] sm:$0xff]   ;;  %v481_v28 = vunpack.c.l.bf16 %v803_v16  ;;  %v482_v29 = vunpack.c.h.bf16 %v803_v16  ;;  %v812_v61 = vld [vmem:[%s1142_s0 + $0x50] sm:$0xff]  }
   0x3   :  { %v818_v2 = vld [vmem:[%s1142_s0 + $0x80] sm:$0xff]   ;;  %v509_v5 = vunpack.c.l.bf16 %v810_v1  ;;  %v510_v6 = vunpack.c.h.bf16 %v810_v1  ;;  %v819_v26 = vld [vmem:[%s1142_s0 + $0x88] sm:$0xff]   ;;  %v513_v30 = vunpack.c.l.bf16 %v811_v17  ;;  %v514_v31 = vunpack.c.h.bf16 %v811_v17 }
   0x4   :  { %v826_v7 = vld [vmem:[%s1142_s0 + $0xc0] sm:$0xff]   ;;  %v541_v8 = vunpack.c.l.bf16 %v818_v2  ;;  %v542_v9 = vunpack.c.h.bf16 %v818_v2  ;;  %v827_v36 = vld [vmem:[%s1142_s0 + $0xc8] sm:$0xff]   ;;  %v545_v39 = vunpack.c.l.bf16 %v819_v26  ;;  %v546_v40 = vunpack.c.h.bf16 %v819_v26 }
   0x5   :  { %v834_v10 = vld [vmem:[%s1142_s0 + $0x100] sm:$0xff]   ;;  %v573_v12 = vunpack.c.l.bf16 %v826_v7  ;;  %v574_v13 = vunpack.c.h.bf16 %v826_v7  ;;  %v297_v14 = vmax.f32 %v477_v3, %v509_v5  ;;  %v305_v15 = vmax.f32 %v478_v4, %v510_v6  ;;  %v835_v41 = vld [vmem:[%s1142_s0 + $0x108] sm:$0xff]   ;;  %v820_v7 = vld [vmem:[%s1142_s0 + $0x90] sm:$0xff]  }
   0x6   :  { %v842_v11 = vld [vmem:[%s1142_s0 + $0x140] sm:$0xff]   ;;  %v605_v18 = vunpack.c.l.bf16 %v834_v10  ;;  %v606_v19 = vunpack.c.h.bf16 %v834_v10  ;;  %v843_v46 = vld [vmem:[%s1142_s0 + $0x148] sm:$0xff]   ;;  %v577_v47 = vunpack.c.l.bf16 %v827_v36  ;;  %v578_v48 = vunpack.c.h.bf16 %v827_v36 }
   0x7   :  { %v850_v20 = vld [vmem:[%s1142_s0 + $0x180] sm:$0xff]   ;;  %v637_v21 = vunpack.c.l.bf16 %v842_v11  ;;  %v638_v22 = vunpack.c.h.bf16 %v842_v11  ;;  %v298_v24 = vmax.f32 %v297_v14, %v541_v8  ;;  %v306_v25 = vmax.f32 %v305_v15, %v542_v9  ;;  %v851_v49 = vld [vmem:[%s1142_s0 + $0x188] sm:$0xff]  }
   0x8   :  { %v858_v23 = vld [vmem:[%s1142_s0 + $0x1c0] sm:$0xff]   ;;  %v669_v32 = vunpack.c.l.bf16 %v850_v20  ;;  %v670_v33 = vunpack.c.h.bf16 %v850_v20  ;;  %v313_v50 = vmax.f32 %v481_v28, %v513_v30  ;;  %v321_v51 = vmax.f32 %v482_v29, %v514_v31  ;;  %v859_v2 = vld [vmem:[%s1142_s0 + $0x1c8] sm:$0xff]  }
   0x9   :  { %v866_v27 = vld [vmem:[%s1142_s0 + $0x200] sm:$0xff]   ;;  %v299_v34 = vmax.f32 %v298_v24, %v573_v12  ;;  %v307_v35 = vmax.f32 %v306_v25, %v574_v13  ;;  %v701_v37 = vunpack.c.l.bf16 %v858_v23  ;;  %v702_v38 = vunpack.c.h.bf16 %v858_v23  ;;  %v867_v10 = vld [vmem:[%s1142_s0 + $0x208] sm:$0xff]   ;;  %v828_v13 = vld [vmem:[%s1142_s0 + $0xd0] sm:$0xff]  }
   0xa   :  { %v733_v42 = vunpack.c.l.bf16 %v866_v27  ;;  %v734_v43 = vunpack.c.h.bf16 %v866_v27  ;;  %v609_v54 = vunpack.c.l.bf16 %v835_v41  ;;  %v610_v55 = vunpack.c.h.bf16 %v835_v41 }
   0xb   :  { %v300_v44 = vmax.f32 %v299_v34, %v605_v18  ;;  %v308_v45 = vmax.f32 %v307_v35, %v606_v19  ;;  %v641_v57 = vunpack.c.l.bf16 %v843_v46  ;;  %v642_v58 = vunpack.c.h.bf16 %v843_v46 }
   0xc   :  { %v314_v59 = vmax.f32 %v313_v50, %v545_v39  ;;  %v322_v60 = vmax.f32 %v321_v51, %v546_v40  ;;  %v673_v0 = vunpack.c.l.bf16 %v851_v49  ;;  %v674_v1 = vunpack.c.h.bf16 %v851_v49 }
   0xd   :  { %v301_v52 = vmax.f32 %v300_v44, %v637_v21  ;;  %v309_v53 = vmax.f32 %v308_v45, %v638_v22  ;;  %v485_v5 = vunpack.c.l.bf16 %v804_v56  ;;  %v486_v6 = vunpack.c.h.bf16 %v804_v56 }
   0xe   :  { %v315_v3 = vmax.f32 %v314_v59, %v577_v47  ;;  %v323_v4 = vmax.f32 %v322_v60, %v578_v48  ;;  %v517_v11 = vunpack.c.l.bf16 %v812_v61  ;;  %v518_v12 = vunpack.c.h.bf16 %v812_v61 }
   0xf   :  { %v302_v62 = vmax.f32 %v301_v52, %v669_v32  ;;  %v310_v63 = vmax.f32 %v309_v53, %v670_v33  ;;  %v705_v14 = vunpack.c.l.bf16 %v859_v2  ;;  %v706_v15 = vunpack.c.h.bf16 %v859_v2 }
  0x10   :  { %v316_v16 = vmax.f32 %v315_v3, %v609_v54  ;;  %v324_v17 = vmax.f32 %v323_v4, %v610_v55 }
  0x11   :  { %v303_v8 = vmax.f32 %v302_v62, %v701_v37  ;;  %v311_v9 = vmax.f32 %v310_v63, %v702_v38 }
  0x12   :  { %6 = vsyncpa [#allocation3], 0  ;;  %v549_v20 = vunpack.c.l.bf16 %v820_v7  ;;  %v550_v21 = vunpack.c.h.bf16 %v820_v7  ;;  %v836_v22 = vld [vmem:[%s1142_s0 + $0x110] sm:$0xff]   ;;  %v737_v23 = vunpack.c.l.bf16 %v867_v10  ;;  %v317_v24 = vmax.f32 %v316_v16, %v641_v57  ;;  %v805_v37 = vld [vmem:[%s1142_s0 + $0x18] sm:$0xff]   ;;  %s910_s5 = smov [#allocation2]   ;;  %s463_s9 = sshll.u32 %s1143_s1, 4  ;;  %s464_s9 = int_to_ptr.hbm [resolvable:$true] %s463_s9 }
  0x13   :  { %v304_v18 = vmax.f32 %v303_v8, %v733_v42  ;;  %v312_v19 = vmax.f32 %v311_v9, %v734_v43  ;;  %v325_v25 = vmax.f32 %v324_v17, %v642_v58  ;;  %v581_v26 = vunpack.c.l.bf16 %v828_v13  ;;  %v844_v27 = vld [vmem:[%s1142_s0 + $0x150] sm:$0xff]   ;;  %v813_v42 = vld [vmem:[%s1142_s0 + $0x58] sm:$0xff]   ;;  %s461_s6 = sshll.u32 %s910_s5, 4  ;;  %s912_s10 = smov 4   ;;  %s462_s6 = int_to_ptr.vmem [resolvable:$true] %s461_s6 }
  0x14   :  { %v582_v29 = vunpack.c.h.bf16 %v828_v13  ;;  %v852_v30 = vld [vmem:[%s1142_s0 + $0x190] sm:$0xff]   ;;  %v329_v31 = vmax.f32 %v485_v5, %v517_v11  ;;  %v337_v32 = vmax.f32 %v486_v6, %v518_v12  ;;  %v738_v33 = vunpack.c.h.bf16 %v867_v10  ;;  %v821_v52 = vld [vmem:[%s1142_s0 + $0x98] sm:$0xff]  }
  0x15   :  { %v766_v28 = vpack.c.bf16 %v312_v19, %v304_v18  ;;  %v318_v34 = vmax.f32 %v317_v24, %v673_v0  ;;  %v326_v35 = vmax.f32 %v325_v25, %v674_v1  ;;  %v613_v36 = vunpack.c.l.bf16 %v836_v22  ;;  %v860_v47 = vld [vmem:[%s1142_s0 + $0x1d0] sm:$0xff]   ;;  %v829_v62 = vld [vmem:[%s1142_s0 + $0xd8] sm:$0xff]   ;;  %v806_v18 = vld [vmem:[%s1142_s0 + $0x20] sm:$0xff]  }
  0x16   :  { %v614_v38 = vunpack.c.h.bf16 %v836_v22  ;;  %v645_v39 = vunpack.c.l.bf16 %v844_v27  ;;  %v330_v40 = vmax.f32 %v329_v31, %v549_v20  ;;  %v338_v41 = vmax.f32 %v337_v32, %v550_v21  ;;  %v868_v55 = vld [vmem:[%s1142_s0 + $0x210] sm:$0xff]   ;;  %v837_v3 = vld [vmem:[%s1142_s0 + $0x118] sm:$0xff]   ;;  %v814_v19 = vld [vmem:[%s1142_s0 + $0x60] sm:$0xff]  }
  0x17   :  { %767 = vst [vmem:[#allocation2] sm:$0xff] %v766_v28   ;;  %v319_v43 = vmax.f32 %v318_v34, %v705_v14  ;;  %v327_v44 = vmax.f32 %v326_v35, %v706_v15  ;;  %v646_v45 = vunpack.c.h.bf16 %v844_v27  ;;  %v677_v46 = vunpack.c.l.bf16 %v852_v30  ;;  %v845_v8 = vld [vmem:[%s1142_s0 + $0x158] sm:$0xff]  }
  0x18   :  { %v331_v48 = vmax.f32 %v330_v40, %v581_v26  ;;  %v339_v49 = vmax.f32 %v338_v41, %v582_v29  ;;  %v489_v50 = vunpack.c.l.bf16 %v805_v37  ;;  %v490_v51 = vunpack.c.h.bf16 %v805_v37  ;;  %v853_v11 = vld [vmem:[%s1142_s0 + $0x198] sm:$0xff]   ;;  %v822_v29 = vld [vmem:[%s1142_s0 + $0xa0] sm:$0xff]  }
  0x19   :  { %v320_v53 = vmax.f32 %v319_v43, %v737_v23  ;;  %v328_v54 = vmax.f32 %v327_v44, %v738_v33  ;;  %v521_v56 = vunpack.c.l.bf16 %v813_v42  ;;  %v522_v57 = vunpack.c.h.bf16 %v813_v42  ;;  %v861_v28 = vld [vmem:[%s1142_s0 + $0x1d8] sm:$0xff]   ;;  %v838_v44 = vld [vmem:[%s1142_s0 + $0x120] sm:$0xff]  }
  0x1a   :  { %v678_v58 = vunpack.c.h.bf16 %v852_v30  ;;  %v709_v59 = vunpack.c.l.bf16 %v860_v47  ;;  %v332_v60 = vmax.f32 %v331_v48, %v613_v36  ;;  %v340_v61 = vmax.f32 %v339_v49, %v614_v38  ;;  %v869_v30 = vld [vmem:[%s1142_s0 + $0x218] sm:$0xff]  }
  0x1b   :  { %v771_v63 = vpack.c.bf16 %v328_v54, %v320_v53  ;;  %v710_v0 = vunpack.c.h.bf16 %v860_v47  ;;  %v553_v1 = vunpack.c.l.bf16 %v821_v52  ;;  %v554_v2 = vunpack.c.h.bf16 %v821_v52  ;;  %v846_v52 = vld [vmem:[%s1142_s0 + $0x160] sm:$0xff]  }
  0x1c   :  { %v741_v4 = vunpack.c.l.bf16 %v868_v55  ;;  %v742_v5 = vunpack.c.h.bf16 %v868_v55  ;;  %v333_v6 = vmax.f32 %v332_v60, %v645_v39  ;;  %v341_v7 = vmax.f32 %v340_v61, %v646_v45  ;;  %v830_v39 = vld [vmem:[%s1142_s0 + $0xe0] sm:$0xff]  }
  0x1d   :  { %874 = vst [vmem:[#allocation2 + $0x8] sm:$0xff] %v771_v63   ;;  %v585_v9 = vunpack.c.l.bf16 %v829_v62  ;;  %v586_v10 = vunpack.c.h.bf16 %v829_v62  ;;  %v345_v12 = vmax.f32 %v489_v50, %v521_v56  ;;  %v353_v13 = vmax.f32 %v490_v51, %v522_v57  ;;  %v854_v53 = vld [vmem:[%s1142_s0 + $0x1a0] sm:$0xff]  }
  0x1e   :  { %v334_v14 = vmax.f32 %v333_v6, %v677_v46  ;;  %v342_v15 = vmax.f32 %v341_v7, %v678_v58  ;;  %v617_v16 = vunpack.c.l.bf16 %v837_v3  ;;  %v618_v17 = vunpack.c.h.bf16 %v837_v3  ;;  %v862_v7 = vld [vmem:[%s1142_s0 + $0x1e0] sm:$0xff]  }
  0x1f   :  { %v649_v20 = vunpack.c.l.bf16 %v845_v8  ;;  %v650_v21 = vunpack.c.h.bf16 %v845_v8  ;;  %v346_v22 = vmax.f32 %v345_v12, %v553_v1  ;;  %v354_v23 = vmax.f32 %v353_v13, %v554_v2 }
  0x20   :  { %v335_v24 = vmax.f32 %v334_v14, %v709_v59  ;;  %v343_v25 = vmax.f32 %v342_v15, %v710_v0  ;;  %v681_v26 = vunpack.c.l.bf16 %v853_v11  ;;  %v682_v27 = vunpack.c.h.bf16 %v853_v11  ;;  %v807_v59 = vld [vmem:[%s1142_s0 + $0x28] sm:$0xff]  }
  0x21   :  { %v347_v31 = vmax.f32 %v346_v22, %v585_v9  ;;  %v355_v32 = vmax.f32 %v354_v23, %v586_v10  ;;  %v493_v33 = vunpack.c.l.bf16 %v806_v18  ;;  %v525_v34 = vunpack.c.l.bf16 %v814_v19  ;;  %v815_v0 = vld [vmem:[%s1142_s0 + $0x68] sm:$0xff]  }
  0x22   :  { %v336_v35 = vmax.f32 %v335_v24, %v741_v4  ;;  %v344_v36 = vmax.f32 %v343_v25, %v742_v5  ;;  %v494_v37 = vunpack.c.h.bf16 %v806_v18  ;;  %v526_v38 = vunpack.c.h.bf16 %v814_v19  ;;  %v823_v10 = vld [vmem:[%s1142_s0 + $0xa8] sm:$0xff]  }
  0x23   :  { %v713_v40 = vunpack.c.l.bf16 %v861_v28  ;;  %v348_v41 = vmax.f32 %v347_v31, %v617_v16  ;;  %v356_v42 = vmax.f32 %v355_v32, %v618_v17  ;;  %v557_v43 = vunpack.c.l.bf16 %v822_v29  ;;  %v831_v15 = vld [vmem:[%s1142_s0 + $0xe8] sm:$0xff]  }
  0x24   :  { %v776_v45 = vpack.c.bf16 %v344_v36, %v336_v35  ;;  %v714_v46 = vunpack.c.h.bf16 %v861_v28  ;;  %v745_v47 = vunpack.c.l.bf16 %v869_v30  ;;  %v558_v48 = vunpack.c.h.bf16 %v822_v29  ;;  %v839_v25 = vld [vmem:[%s1142_s0 + $0x128] sm:$0xff]  }
  0x25   :  { %v349_v49 = vmax.f32 %v348_v41, %v649_v20  ;;  %v357_v50 = vmax.f32 %v356_v42, %v650_v21  ;;  %v589_v51 = vunpack.c.l.bf16 %v830_v39  ;;  %v361_v54 = vmax.f32 %v493_v33, %v525_v34  ;;  %v870_v21 = vld [vmem:[%s1142_s0 + $0x220] sm:$0xff]   ;;  %v847_v32 = vld [vmem:[%s1142_s0 + $0x168] sm:$0xff]  }
  0x26   :  { %875 = vst [vmem:[#allocation2 + $0x10] sm:$0xff] %v776_v45   ;;  %v746_v55 = vunpack.c.h.bf16 %v869_v30  ;;  %v590_v56 = vunpack.c.h.bf16 %v830_v39  ;;  %v621_v57 = vunpack.c.l.bf16 %v838_v44  ;;  %v369_v58 = vmax.f32 %v494_v37, %v526_v38  ;;  %v855_v33 = vld [vmem:[%s1142_s0 + $0x1a8] sm:$0xff]   ;;  %v816_v45 = vld [vmem:[%s1142_s0 + $0x70] sm:$0xff]  }
  0x27   :  { %v350_v60 = vmax.f32 %v349_v49, %v681_v26  ;;  %v358_v61 = vmax.f32 %v357_v50, %v682_v27  ;;  %v622_v62 = vunpack.c.h.bf16 %v838_v44  ;;  %v362_v63 = vmax.f32 %v361_v54, %v557_v43 }
  0x28   :  { %v653_v1 = vunpack.c.l.bf16 %v846_v52  ;;  %v654_v2 = vunpack.c.h.bf16 %v846_v52  ;;  %v685_v3 = vunpack.c.l.bf16 %v854_v53  ;;  %v370_v4 = vmax.f32 %v369_v58, %v558_v48 }
  0x29   :  { %v351_v5 = vmax.f32 %v350_v60, %v713_v40  ;;  %v359_v6 = vmax.f32 %v358_v61, %v714_v46  ;;  %v363_v8 = vmax.f32 %v362_v63, %v589_v51  ;;  %v497_v9 = vunpack.c.l.bf16 %v807_v59  ;;  %v808_v40 = vld [vmem:[%s1142_s0 + $0x30] sm:$0xff]   ;;  %v863_v51 = vld [vmem:[%s1142_s0 + $0x1e8] sm:$0xff]  }
  0x2a   :  { %v371_v11 = vmax.f32 %v370_v4, %v590_v56  ;;  %v498_v12 = vunpack.c.h.bf16 %v807_v59  ;;  %v529_v13 = vunpack.c.l.bf16 %v815_v0  ;;  %v530_v14 = vunpack.c.h.bf16 %v815_v0  ;;  %v832_v0 = vld [vmem:[%s1142_s0 + $0xf0] sm:$0xff]  }
  0x2b   :  { %v352_v16 = vmax.f32 %v351_v5, %v745_v47  ;;  %v360_v17 = vmax.f32 %v359_v6, %v746_v55  ;;  %v686_v18 = vunpack.c.h.bf16 %v854_v53  ;;  %v364_v19 = vmax.f32 %v363_v8, %v621_v57  ;;  %v824_v55 = vld [vmem:[%s1142_s0 + $0xb0] sm:$0xff]  }
  0x2c   :  { %v717_v20 = vunpack.c.l.bf16 %v862_v7  ;;  %v372_v22 = vmax.f32 %v371_v11, %v622_v62  ;;  %v561_v23 = vunpack.c.l.bf16 %v823_v10  ;;  %v562_v24 = vunpack.c.h.bf16 %v823_v10 }
  0x2d   :  { %v781_v26 = vpack.c.bf16 %v360_v17, %v352_v16  ;;  %v718_v27 = vunpack.c.h.bf16 %v862_v7  ;;  %v365_v28 = vmax.f32 %v364_v19, %v653_v1  ;;  %v593_v29 = vunpack.c.l.bf16 %v831_v15  ;;  %v809_v19 = vld [vmem:[%s1142_s0 + $0x38] sm:$0xff]  }
  0x2e   :  { %v373_v30 = vmax.f32 %v372_v22, %v654_v2  ;;  %v594_v31 = vunpack.c.h.bf16 %v831_v15  ;;  %v377_v34 = vmax.f32 %v497_v9, %v529_v13  ;;  %v385_v35 = vmax.f32 %v498_v12, %v530_v14  ;;  %v871_v2 = vld [vmem:[%s1142_s0 + $0x228] sm:$0xff]   ;;  %v840_v9 = vld [vmem:[%s1142_s0 + $0x130] sm:$0xff]  }
  0x2f   :  { %876 = vst [vmem:[#allocation2 + $0x18] sm:$0xff] %v781_v26   ;;  %v749_v36 = vunpack.c.l.bf16 %v870_v21  ;;  %v750_v37 = vunpack.c.h.bf16 %v870_v21  ;;  %v366_v38 = vmax.f32 %v365_v28, %v685_v3  ;;  %v625_v39 = vunpack.c.l.bf16 %v839_v25  ;;  %v848_v12 = vld [vmem:[%s1142_s0 + $0x170] sm:$0xff]  }
  0x30   :  { %v374_v41 = vmax.f32 %v373_v30, %v686_v18  ;;  %v626_v42 = vunpack.c.h.bf16 %v839_v25  ;;  %v378_v43 = vmax.f32 %v377_v34, %v561_v23  ;;  %v386_v44 = vmax.f32 %v385_v35, %v562_v24  ;;  %v817_v24 = vld [vmem:[%s1142_s0 + $0x78] sm:$0xff]  }
  0x31   :  { %v367_v46 = vmax.f32 %v366_v38, %v717_v20  ;;  %v657_v47 = vunpack.c.l.bf16 %v847_v32  ;;  %v658_v48 = vunpack.c.h.bf16 %v847_v32  ;;  %v689_v49 = vunpack.c.l.bf16 %v855_v33  ;;  %v825_v34 = vld [vmem:[%s1142_s0 + $0xb8] sm:$0xff]  }
  0x32   :  { %v375_v50 = vmax.f32 %v374_v41, %v718_v27  ;;  %v379_v52 = vmax.f32 %v378_v43, %v593_v29  ;;  %v387_v53 = vmax.f32 %v386_v44, %v594_v31  ;;  %v501_v54 = vunpack.c.l.bf16 %v808_v40  ;;  %v856_v29 = vld [vmem:[%s1142_s0 + $0x1b0] sm:$0xff]   ;;  %v833_v44 = vld [vmem:[%s1142_s0 + $0xf8] sm:$0xff]  }
  0x33   :  { %v368_v56 = vmax.f32 %v367_v46, %v749_v36  ;;  %v502_v57 = vunpack.c.h.bf16 %v808_v40  ;;  %v533_v58 = vunpack.c.l.bf16 %v816_v45  ;;  %v534_v59 = vunpack.c.h.bf16 %v816_v45  ;;  %v872_v46 = vld [vmem:[%s1142_s0 + $0x230] sm:$0xff]  }
  0x34   :  { %v376_v60 = vmax.f32 %v375_v50, %v750_v37  ;;  %v690_v61 = vunpack.c.h.bf16 %v855_v33  ;;  %v380_v62 = vmax.f32 %v379_v52, %v625_v39  ;;  %v388_v63 = vmax.f32 %v387_v53, %v626_v42  ;;  %v864_v37 = vld [vmem:[%s1142_s0 + $0x1f0] sm:$0xff]   ;;  %v841_v53 = vld [vmem:[%s1142_s0 + $0x138] sm:$0xff]  }
  0x35   :  { %v721_v1 = vunpack.c.l.bf16 %v863_v51  ;;  %v565_v3 = vunpack.c.l.bf16 %v824_v55  ;;  %v566_v4 = vunpack.c.h.bf16 %v824_v55  ;;  %v722_v6 = vunpack.c.h.bf16 %v863_v51 }
  0x36   :  { %v786_v5 = vpack.c.bf16 %v376_v60, %v368_v56  ;;  %v381_v7 = vmax.f32 %v380_v62, %v657_v47  ;;  %v389_v8 = vmax.f32 %v388_v63, %v658_v48  ;;  %v597_v10 = vunpack.c.l.bf16 %v832_v0  ;;  %v849_v62 = vld [vmem:[%s1142_s0 + $0x178] sm:$0xff]  }
  0x37   :  { %v598_v11 = vunpack.c.h.bf16 %v832_v0  ;;  %v393_v13 = vmax.f32 %v501_v54, %v533_v58  ;;  %v401_v14 = vmax.f32 %v502_v57, %v534_v59  ;;  %v753_v15 = vunpack.c.l.bf16 %v871_v2 }
  0x38   :  { %877 = vst [vmem:[#allocation2 + $0x20] sm:$0xff] %v786_v5   ;;  %v754_v16 = vunpack.c.h.bf16 %v871_v2  ;;  %v382_v17 = vmax.f32 %v381_v7, %v689_v49  ;;  %v390_v18 = vmax.f32 %v389_v8, %v690_v61  ;;  %v629_v20 = vunpack.c.l.bf16 %v840_v9  ;;  %v857_v5 = vld [vmem:[%s1142_s0 + $0x1b8] sm:$0xff]  }
  0x39   :  { %v630_v21 = vunpack.c.h.bf16 %v840_v9  ;;  %v394_v22 = vmax.f32 %v393_v13, %v565_v3  ;;  %v402_v23 = vmax.f32 %v401_v14, %v566_v4  ;;  %v661_v27 = vunpack.c.l.bf16 %v848_v12 }
  0x3a   :  { %v383_v25 = vmax.f32 %v382_v17, %v721_v1  ;;  %v391_v26 = vmax.f32 %v390_v18, %v722_v6  ;;  %v662_v28 = vunpack.c.h.bf16 %v848_v12  ;;  %v505_v32 = vunpack.c.l.bf16 %v809_v19  ;;  %v865_v12 = vld [vmem:[%s1142_s0 + $0x1f8] sm:$0xff]  }
  0x3b   :  { %v395_v30 = vmax.f32 %v394_v22, %v597_v10  ;;  %v403_v31 = vmax.f32 %v402_v23, %v598_v11  ;;  %v506_v33 = vunpack.c.h.bf16 %v809_v19  ;;  %v537_v38 = vunpack.c.l.bf16 %v817_v24  ;;  %v873_v18 = vld [vmem:[%s1142_s0 + $0x238] sm:$0xff]   ;;  %s911_s0 = smov 64  }
  0x3c   :  { %v384_v35 = vmax.f32 %v383_v25, %v753_v15  ;;  %v392_v36 = vmax.f32 %v391_v26, %v754_v16  ;;  %v538_v39 = vunpack.c.h.bf16 %v817_v24  ;;  %v693_v40 = vunpack.c.l.bf16 %v856_v29 }
  0x3d   :  { %v694_v41 = vunpack.c.h.bf16 %v856_v29  ;;  %v396_v42 = vmax.f32 %v395_v30, %v629_v20  ;;  %v404_v43 = vmax.f32 %v403_v31, %v630_v21  ;;  %v569_v47 = vunpack.c.l.bf16 %v825_v34 }
  0x3e   :  { %v791_v45 = vpack.c.bf16 %v392_v36, %v384_v35  ;;  %v570_v48 = vunpack.c.h.bf16 %v825_v34  ;;  %v725_v49 = vunpack.c.l.bf16 %v864_v37  ;;  %v726_v50 = vunpack.c.h.bf16 %v864_v37 }
  0x3f   :  { %v397_v51 = vmax.f32 %v396_v42, %v661_v27  ;;  %v405_v52 = vmax.f32 %v404_v43, %v662_v28  ;;  %v601_v54 = vunpack.c.l.bf16 %v833_v44  ;;  %v602_v55 = vunpack.c.h.bf16 %v833_v44 }
  0x40   :  { %878 = vst [vmem:[#allocation2 + $0x28] sm:$0xff] %v791_v45   ;;  %v409_v56 = vmax.f32 %v505_v32, %v537_v38  ;;  %v417_v57 = vmax.f32 %v506_v33, %v538_v39  ;;  %v757_v58 = vunpack.c.l.bf16 %v872_v46  ;;  %v758_v59 = vunpack.c.h.bf16 %v872_v46 }
  0x41   :  { %v398_v60 = vmax.f32 %v397_v51, %v693_v40  ;;  %v406_v61 = vmax.f32 %v405_v52, %v694_v41  ;;  %v633_v63 = vunpack.c.l.bf16 %v841_v53  ;;  %v634_v0 = vunpack.c.h.bf16 %v841_v53 }
  0x42   :  { %v410_v1 = vmax.f32 %v409_v56, %v569_v47  ;;  %v418_v2 = vmax.f32 %v417_v57, %v570_v48  ;;  %v665_v6 = vunpack.c.l.bf16 %v849_v62  ;;  %v666_v7 = vunpack.c.h.bf16 %v849_v62 }
  0x43   :  { %v399_v3 = vmax.f32 %v398_v60, %v725_v49  ;;  %v407_v4 = vmax.f32 %v406_v61, %v726_v50  ;;  %v697_v13 = vunpack.c.l.bf16 %v857_v5  ;;  %v698_v14 = vunpack.c.h.bf16 %v857_v5 }
  0x44   :  { %v411_v8 = vmax.f32 %v410_v1, %v601_v54  ;;  %v419_v9 = vmax.f32 %v418_v2, %v602_v55  ;;  %v729_v19 = vunpack.c.l.bf16 %v865_v12  ;;  %v730_v20 = vunpack.c.h.bf16 %v865_v12 }
  0x45   :  { %v400_v10 = vmax.f32 %v399_v3, %v757_v58  ;;  %v408_v11 = vmax.f32 %v407_v4, %v758_v59  ;;  %v761_v23 = vunpack.c.l.bf16 %v873_v18  ;;  %v762_v24 = vunpack.c.h.bf16 %v873_v18 }
  0x46   :  { %v412_v15 = vmax.f32 %v411_v8, %v633_v63  ;;  %v420_v16 = vmax.f32 %v419_v9, %v634_v0 }
  0x47   :  { %v796_v17 = vpack.c.bf16 %v408_v11, %v400_v10 }
  0x48   :  { %v413_v21 = vmax.f32 %v412_v15, %v665_v6  ;;  %v421_v22 = vmax.f32 %v420_v16, %v666_v7 }
  0x49   :  { %879 = vst [vmem:[#allocation2 + $0x30] sm:$0xff] %v796_v17  }
  0x4a   :  { %v414_v25 = vmax.f32 %v413_v21, %v697_v13  ;;  %v422_v26 = vmax.f32 %v421_v22, %v698_v14 }
  0x4c   :  { %v415_v27 = vmax.f32 %v414_v25, %v729_v19  ;;  %v423_v28 = vmax.f32 %v422_v26, %v730_v20 }
  0x4e   :  { %v416_v29 = vmax.f32 %v415_v27, %v761_v23  ;;  %v424_v30 = vmax.f32 %v423_v28, %v762_v24 }
  0x50   :  { %v801_v31 = vpack.c.bf16 %v424_v30, %v416_v29 }
  0x52   :  { %880 = vst [vmem:[#allocation2 + $0x38] sm:$0xff] %v801_v31  }
  0x53   :  { %469 = dma.vmem_to_hbm [thread:$0]  %s462_s6, 1024, %s464_s9, [#allocation3], %s911_s0, %s911_s0, %s912_s10  }
  0x54   :  { %908 = dma.done.wait [#allocation3], 1024  }
  0x55   :  { %909 = vsyncadd [#allocation3], 4294966272 }
  0x56   :  { %474 = vsyncpa [#allocation3], 1 }

</bundles_post_ra>
